<compile_context>
chip_gen: v6e
topology: v6e:2x2x1
jax: 0.10.0
libtpu: 0.0.40
codegen_flags: <defaults>
</compile_context>

<pallas_src>
import jax
import jax.numpy as jnp
from jax import lax
from jax.experimental import pallas as pl
from jax.experimental.pallas import tpu as pltpu


def _image_proj_kernel(x_ref, w_ref, b_ref, g_ref, beta_ref, o_ref):
    # x_ref:    (B, d_in)     input embeddings (full, reused every step)
    # w_ref:    (d_in, n*C)   proj-weight column block for this token block
    # b_ref:    (1, n*C)      bias slice for this token block
    # g_ref:    (1, C)        LayerNorm gamma
    # beta_ref: (1, C)        LayerNorm beta
    # o_ref:    (B, n*C)      lane-dense output slab for this token block
    B = x_ref.shape[0]
    nC = w_ref.shape[1]
    C = g_ref.shape[1]
    n = nC // C

    # MXU matmul with f32 accumulation (inputs may be bf16).
    y = jnp.dot(x_ref[...], w_ref[...], preferred_element_type=jnp.float32)
    y = y + b_ref[...].astype(jnp.float32)                      # (B, n*C)

    # LayerNorm over each C-wide token segment: view as (B*n, C).
    # (Valid because y is row-major contiguous per batch row.)
    y = y.reshape(B * n, C)
    mean = jnp.mean(y, axis=-1, keepdims=True)
    var = jnp.mean(jnp.square(y - mean), axis=-1, keepdims=True)
    y_hat = (y - mean) * lax.rsqrt(var + 1e-5)                  # eps = torch default
    out = y_hat * g_ref[...].astype(jnp.float32) + beta_ref[...].astype(jnp.float32)

    o_ref[...] = out.reshape(B, nC).astype(o_ref.dtype)


def _choose_tokens_per_block(T, C, d_in, bytes_per_el,
                             w_block_budget_bytes=8 * 1024 * 1024):
    """Largest divisor n of T such that one W block (d_in, n*C) fits the budget
    (budget is per buffer; Pallas double-buffers, so 2x this lands in VMEM)."""
    best = 1
    for n in range(1, T + 1):
        if T % n == 0 and d_in * n * C * bytes_per_el <= w_block_budget_bytes:
            best = n
    return best


def image_proj_model(image_embeds, w, b, gamma, beta, *,
                     clip_extra_context_tokens, cross_attention_dim,
                     compute_dtype=jnp.float32, out_dtype=None):
    """Pallas equivalent of ImageProjModel.forward.

    image_embeds: (B, clip_embeddings_dim)
    w:            (clip_embeddings_dim, T*C)   (x @ w convention, i.e. torch weight.T)
    b:            (T*C,)
    gamma, beta:  (C,)
    returns:      (B, T, C)
    """
    B, d_in = image_embeds.shape
    T = clip_extra_context_tokens
    C = cross_attention_dim
    assert w.shape == (d_in, T * C)
    if out_dtype is None:
        out_dtype = image_embeds.dtype

    # Optional bf16 compute for the HBM-dominant operands; LN params stay f32.
    x_c = image_embeds.astype(compute_dtype)
    w_c = w.astype(compute_dtype)
    b2 = b.reshape(1, T * C).astype(jnp.float32)
    g2 = gamma.reshape(1, C).astype(jnp.float32)
    beta2 = beta.reshape(1, C).astype(jnp.float32)

    # Token-block size: fuse everything into one step when W fits VMEM
    # (always true at demo shapes); otherwise tile the T*C axis.
    n = _choose_tokens_per_block(T, C, d_in, jnp.dtype(compute_dtype).itemsize)
    grid = (T // n,)

    out_flat = pl.pallas_call(
        _image_proj_kernel,
        out_shape=jax.ShapeDtypeStruct((B, T * C), out_dtype),
        grid_spec=pltpu.PrefetchScalarGridSpec(
            num_scalar_prefetch=0,
            grid=grid,
            in_specs=[
                pl.BlockSpec((B, d_in), lambda t: (0, 0)),     # x: full, reused
                pl.BlockSpec((d_in, n * C), lambda t: (0, t)), # W: token-block columns
                pl.BlockSpec((1, n * C), lambda t: (0, t)),    # bias slice
                pl.BlockSpec((1, C), lambda t: (0, 0)),        # gamma
                pl.BlockSpec((1, C), lambda t: (0, 0)),        # beta
            ],
            out_specs=pl.BlockSpec((B, n * C), lambda t: (0, t)),
        ),
        compiler_params=pltpu.CompilerParams(
            dimension_semantics=("arbitrary",),
        ),
    )(x_c, w_c, b2, g2, beta2)

    # Free row-major reshape (no transpose, no extra HBM pass).
    return out_flat.reshape(B, T, C)


def _reference(image_embeds, w, b, gamma, beta, T, C):
    y = image_embeds.astype(jnp.float32) @ w.astype(jnp.float32) + b
    y = y.reshape(-1, T, C)
    mean = y.mean(axis=-1, keepdims=True)
    var = ((y - mean) ** 2).mean(axis=-1, keepdims=True)
    return (y - mean) / jnp.sqrt(var + 1e-5) * gamma + beta


if __name__ == "__main__":
    # Small shapes consistent with the module's forward:
    #   batch=2, clip_embeddings_dim=256, cross_attention_dim=128, extra tokens=4
    B = 2
    clip_embeddings_dim = 256
    cross_attention_dim = 128
    clip_extra_context_tokens = 4

    key = jax.random.PRNGKey(0)
    k_x, k_w, k_b = jax.random.split(key, 3)

    image_embeds = jax.random.normal(k_x, (B, clip_embeddings_dim), dtype=jnp.float32)
    w = jax.random.normal(
        k_w, (clip_embeddings_dim, clip_extra_context_tokens * cross_attention_dim),
        dtype=jnp.float32) * 0.02
    b = jax.random.normal(
        k_b, (clip_extra_context_tokens * cross_attention_dim,), dtype=jnp.float32) * 0.02
    gamma = jnp.ones((cross_attention_dim,), dtype=jnp.float32)
    beta = jnp.zeros((cross_attention_dim,), dtype=jnp.float32)

    ref = _reference(image_embeds, w, b, gamma, beta,
                     clip_extra_context_tokens, cross_attention_dim)

    # --- f32 compute path (matches reference tightly) ---
    out_f32 = image_proj_model(
        image_embeds, w, b, gamma, beta,
        clip_extra_context_tokens=clip_extra_context_tokens,
        cross_attention_dim=cross_attention_dim,
        compute_dtype=jnp.float32,
    )
    out_f32 = jax.block_until_ready(out_f32)
    assert out_f32.shape == (B, clip_extra_context_tokens, cross_attention_dim), out_f32.shape
    assert jnp.allclose(out_f32, ref, atol=1e-4, rtol=1e-4), "f32 path mismatch vs reference"

    # --- bf16 compute path (halves the dominant W DMA; f32 accumulation + f32 LN) ---
    out_bf16 = image_proj_model(
        image_embeds, w, b, gamma, beta,
        clip_extra_context_tokens=clip_extra_context_tokens,
        cross_attention_dim=cross_attention_dim,
        compute_dtype=jnp.bfloat16,
    )
    out_bf16 = jax.block_until_ready(out_bf16)
    assert out_bf16.shape == (B, clip_extra_context_tokens, cross_attention_dim)
    assert jnp.allclose(out_bf16.astype(jnp.float32), ref, atol=5e-2, rtol=5e-2), \
        "bf16 path mismatch vs reference"

    print("KERNEL_OK")
</pallas_src>

<mosaic_0001>
module attributes {stable_mosaic.version = 11 : i64} {
  func.func @_image_proj_kernel(%arg0: i32, %arg1: memref<2x256xf32, #tpu.memory_space<vmem>>, %arg2: memref<256x512xf32, #tpu.memory_space<vmem>>, %arg3: memref<1x512xf32, #tpu.memory_space<vmem>>, %arg4: memref<1x128xf32, #tpu.memory_space<vmem>>, %arg5: memref<1x128xf32, #tpu.memory_space<vmem>>, %arg6: memref<2x512xf32, #tpu.memory_space<vmem>>) attributes {dimension_semantics = [#tpu.dimension_semantics<arbitrary>], iteration_bounds = array<i64: 1>, scalar_prefetch = 0 : i64, scratch_operands = 0 : i64, tpu.core_type = #tpu.core_type<tc>, window_params = [{pipeline_mode = #tpu.pipeline_mode<synchronous>, transform_indices = @transform_0, window_bounds = array<i64: 2, 256>}, {transform_indices = @transform_1, window_bounds = array<i64: 256, 512>}, {transform_indices = @transform_2, window_bounds = array<i64: 1, 512>}, {pipeline_mode = #tpu.pipeline_mode<synchronous>, transform_indices = @transform_3, window_bounds = array<i64: 1, 128>}, {pipeline_mode = #tpu.pipeline_mode<synchronous>, transform_indices = @transform_4, window_bounds = array<i64: 1, 128>}, {transform_indices = @transform_5, window_bounds = array<i64: 2, 512>}]} {
    %c0 = arith.constant 0 : index
    %c0_0 = arith.constant 0 : index
    %0 = vector.load %arg1[%c0, %c0_0] : memref<2x256xf32, #tpu.memory_space<vmem>>, vector<2x256xf32>
    %c0_1 = arith.constant 0 : index
    %c0_2 = arith.constant 0 : index
    %1 = vector.load %arg2[%c0_1, %c0_2] : memref<256x512xf32, #tpu.memory_space<vmem>>, vector<256x512xf32>
    %cst = arith.constant dense<0.000000e+00> : vector<2x512xf32>
    %2 = tpu.matmul %0, %1, %cst {dimension_numbers = #tpu.dot_dimension_numbers<[1], [0], [0], [1], [0, 0, 1, 1], [], []>} : vector<2x256xf32>, vector<256x512xf32>, vector<2x512xf32> -> vector<2x512xf32>
    %c0_3 = arith.constant 0 : index
    %c0_4 = arith.constant 0 : index
    %3 = vector.load %arg3[%c0_3, %c0_4] : memref<1x512xf32, #tpu.memory_space<vmem>>, vector<1x512xf32>
    %4 = vector.broadcast %3 : vector<1x512xf32> to vector<2x512xf32>
    %5 = arith.addf %2, %4 : vector<2x512xf32>
    %6 = vector.shape_cast %5 : vector<2x512xf32> to vector<8x128xf32>
    %cst_5 = arith.constant dense<0.000000e+00> : vector<8xf32>
    %7 = vector.multi_reduction <add>, %6, %cst_5 [1] : vector<8x128xf32> to vector<8xf32>
    %8 = vector.shape_cast %7 : vector<8xf32> to vector<8x1xf32>
    %cst_6 = arith.constant 1.280000e+02 : f32
    %9 = vector.broadcast %cst_6 : f32 to vector<8x1xf32>
    %10 = arith.divf %8, %9 : vector<8x1xf32>
    %11 = vector.broadcast %10 : vector<8x1xf32> to vector<8x128xf32>
    %12 = arith.subf %6, %11 : vector<8x128xf32>
    %13 = arith.mulf %12, %12 : vector<8x128xf32>
    %cst_7 = arith.constant dense<0.000000e+00> : vector<8xf32>
    %14 = vector.multi_reduction <add>, %13, %cst_7 [1] : vector<8x128xf32> to vector<8xf32>
    %15 = vector.shape_cast %14 : vector<8xf32> to vector<8x1xf32>
    %cst_8 = arith.constant 1.280000e+02 : f32
    %16 = vector.broadcast %cst_8 : f32 to vector<8x1xf32>
    %17 = arith.divf %15, %16 : vector<8x1xf32>
    %18 = vector.broadcast %10 : vector<8x1xf32> to vector<8x128xf32>
    %19 = arith.subf %6, %18 : vector<8x128xf32>
    %cst_9 = arith.constant 9.99999974E-6 : f32
    %20 = vector.broadcast %cst_9 : f32 to vector<8x1xf32>
    %21 = arith.addf %17, %20 : vector<8x1xf32>
    %22 = math.rsqrt %21 : vector<8x1xf32>
    %23 = vector.broadcast %22 : vector<8x1xf32> to vector<8x128xf32>
    %24 = arith.mulf %19, %23 : vector<8x128xf32>
    %c0_10 = arith.constant 0 : index
    %c0_11 = arith.constant 0 : index
    %25 = vector.load %arg4[%c0_10, %c0_11] : memref<1x128xf32, #tpu.memory_space<vmem>>, vector<1x128xf32>
    %26 = vector.broadcast %25 : vector<1x128xf32> to vector<8x128xf32>
    %27 = arith.mulf %24, %26 : vector<8x128xf32>
    %c0_12 = arith.constant 0 : index
    %c0_13 = arith.constant 0 : index
    %28 = vector.load %arg5[%c0_12, %c0_13] : memref<1x128xf32, #tpu.memory_space<vmem>>, vector<1x128xf32>
    %29 = vector.broadcast %28 : vector<1x128xf32> to vector<8x128xf32>
    %30 = arith.addf %27, %29 : vector<8x128xf32>
    %31 = vector.shape_cast %30 : vector<8x128xf32> to vector<2x512xf32>
    %c0_14 = arith.constant 0 : index
    %c0_15 = arith.constant 0 : index
    %32 = vector.load %arg6[%c0_14, %c0_15] : memref<2x512xf32, #tpu.memory_space<vmem>>, vector<2x512xf32>
    tpu.vector_store %arg6[%c0_14, %c0_15], %31 {strides = array<i32>} : memref<2x512xf32, #tpu.memory_space<vmem>>, vector<2x512xf32>,
    return
  }
  func.func @transform_0(%arg0: i32) -> (i32, i32) {
    %c0_i32 = arith.constant 0 : i32
    %c0_i32_0 = arith.constant 0 : i32
    %c0_i32_1 = arith.constant 0 : i32
    return %c0_i32, %c0_i32_0 : i32, i32
  }
  func.func @transform_1(%arg0: i32) -> (i32, i32) {
    %c0_i32 = arith.constant 0 : i32
    %c0_i32_0 = arith.constant 0 : i32
    return %c0_i32, %arg0 : i32, i32
  }
  func.func @transform_2(%arg0: i32) -> (i32, i32) {
    %c0_i32 = arith.constant 0 : i32
    %c0_i32_0 = arith.constant 0 : i32
    return %c0_i32, %arg0 : i32, i32
  }
  func.func @transform_3(%arg0: i32) -> (i32, i32) {
    %c0_i32 = arith.constant 0 : i32
    %c0_i32_0 = arith.constant 0 : i32
    %c0_i32_1 = arith.constant 0 : i32
    return %c0_i32, %c0_i32_0 : i32, i32
  }
  func.func @transform_4(%arg0: i32) -> (i32, i32) {
    %c0_i32 = arith.constant 0 : i32
    %c0_i32_0 = arith.constant 0 : i32
    %c0_i32_1 = arith.constant 0 : i32
    return %c0_i32, %c0_i32_0 : i32, i32
  }
  func.func @transform_5(%arg0: i32) -> (i32, i32) {
    %c0_i32 = arith.constant 0 : i32
    %c0_i32_0 = arith.constant 0 : i32
    return %c0_i32, %arg0 : i32, i32
  }
}

</mosaic_0001>

<bundles_post_ra>
// kernel: tpu_custom_call.1
= control target key start
LH: loop header
LB: loop body
LE: loop exit
PB: predicated region body
PF: predicated region fallthrough
CT: control target
= control target key end

     0   :  { %10 = vsyncpa [#allocation3], 0  ;;  %s599_s0 = inlined_call_operand.hbm [shape: f32[2,256], index: 0, kind: input, shape index: {}]   ;;  %s600_s1 = inlined_call_operand.hbm [shape: f32[256,512], index: 1, kind: input, shape index: {}]   ;;  %s601_s2 = inlined_call_operand.hbm [shape: f32[1,512], index: 2, kind: input, shape index: {}]   ;;  %s602_s3 = inlined_call_operand.vmem [shape: f32[1,128], index: 3, kind: input, shape index: {}]   ;;  %s603_s4 = inlined_call_operand.vmem [shape: f32[1,128], index: 4, kind: input, shape index: {}]   ;;  %s604_s5 = inlined_call_operand.hbm [shape: f32[2,512], index: 5, kind: output, shape index: {}]  }
   0x1   :  { %11 = vsyncpa [#allocation6], 0 }
   0x2   :  { %12 = vsyncpa [#allocation4], 0  ;;  %s543_s18 = smov [#allocation5]  }
   0x3   :  { %s28_s19 = sshll.u32 %s543_s18, 4  ;;  %s29_s19 = int_to_ptr.vmem [resolvable:$true] %s28_s19 }
   0x4   :  { %s465_s20 = scalar_lea.vmem %s29_s19, 16384  ;;  %p470_p1 = scmp.lt.s32.totalorder %s29_s19, %s29_s19 }
   0x5   :  { %p466_p0 = scmp.ne.s32.totalorder %s29_s19, %s465_s20  ;;  %p471_p2 = scmp.lt.s32.totalorder %s465_s20, %s465_s20 }
   0x7   :  { %p472_p3 = por %p471_p2, %p470_p1 }
   0x9   :  { %p473_p4 = pnand %p472_p3, %p466_p0 }
   0xb   :  { %476 = shalt.err (!%p473_p4)
}
   0xc   :  { %s544_s21 = smov 512   ;;  %s545_s22 = smov 32  }
   0xd   :  { %34 = dma.hbm_to_vmem [thread:$0]  %s600_s1, 16384, %s29_s19, [#allocation6], %s544_s21, %s544_s21, %s545_s22  }
   0xe   :  { %s546_s25 = smov [#allocation2]   ;;  %s547_s27 = smov [#allocation7]  }
   0xf   :  { %s19_s26 = sshll.u32 %s546_s25, 4  ;;  %s41_s28 = sshll.u32 %s547_s27, 4  ;;  %s20_s26 = int_to_ptr.vmem [resolvable:$true] %s19_s26  ;;  %s42_s28 = int_to_ptr.vmem [resolvable:$true] %s41_s28 }
  0x10   :  { %s485_s29 = scalar_lea.vmem %s20_s26, 64  ;;  %p490_p6 = scmp.lt.s32.totalorder %s20_s26, %s20_s26 }
  0x11   :  { %p486_p5 = scmp.ne.s32.totalorder %s20_s26, %s485_s29  ;;  %p491_p7 = scmp.lt.s32.totalorder %s485_s29, %s485_s29 }
  0x13   :  { %p492_p8 = por %p491_p7, %p490_p6 }
  0x15   :  { %p493_p9 = pnand %p492_p8, %p486_p5 }
  0x17   :  { %496 = shalt.err (!%p493_p9)
}
  0x18   :  { %22 = dma.hbm_to_vmem [thread:$0]  %s599_s0, 64, %s20_s26, [#allocation3]  }
  0x19   :  { %s505_s7 = scalar_lea.vmem %s42_s28, 64  ;;  %p510_p11 = scmp.lt.s32.totalorder %s42_s28, %s42_s28 }
  0x1a   :  { %p506_p10 = scmp.ne.s32.totalorder %s42_s28, %s505_s7  ;;  %p511_p12 = scmp.lt.s32.totalorder %s505_s7, %s505_s7 }
  0x1c   :  { %p512_p13 = por %p511_p12, %p510_p11 }
  0x1e   :  { %p513_p0 = pnand %p512_p13, %p506_p10 }
  0x20   :  { %516 = shalt.err (!%p513_p0)
}
  0x21   :  { %44 = dma.hbm_to_vmem [thread:$0]  %s601_s2, 64, %s42_s28, [#allocation6]  }
  0x22   :  { %537 = dma.done.wait [#allocation3], 64  }
  0x23   :  { %538 = vsyncadd [#allocation3], 4294967232 }
  0x24   :  { %539 = dma.done.wait [#allocation6], 16448  }
  0x25   :  { %540 = vsyncadd [#allocation6], 4294950848  ;;  %v120_v0 = vld [vmem:[#allocation5 + $0x1e8] sm:$0xff]  ;;  %v122_v1 = vld [vmem:[#allocation5 + $0x1f8] sm:$0xff]  ;;  %s550_s11 = smov [#allocation8]  }
  0x26   :  { %v119_v2 = vld [vmem:[#allocation5 + $0x1e0] sm:$0xff]  ;;  %220 = vmatprep.subr.mxu0 %v120_v0  ;;  %291 = vmatprep.subr.mxu1 %v122_v1  ;;  %v121_v3 = vld [vmem:[#allocation5 + $0x1f0] sm:$0xff]  ;;  %v116_v4 = vld [vmem:[#allocation5 + $0x1c8] sm:$0xff]  ;;  %s433_s12 = sshll.u32 %s550_s11, 4  ;;  %s434_s12 = int_to_ptr.vmem [resolvable:$true] %s433_s12 }
  0x27   :  { %v118_v5 = vld [vmem:[#allocation5 + $0x1d8] sm:$0xff]  ;;  %221 = vmatpush1.msra.mxu0 %v119_v2  ;;  %292 = vmatpush1.msra.mxu1 %v121_v3  ;;  %v115_v6 = vld [vmem:[#allocation5 + $0x1c0] sm:$0xff]  ;;  %v117_v7 = vld [vmem:[#allocation5 + $0x1d0] sm:$0xff]  ;;  %s517_s13 = scalar_lea.vmem %s434_s12, 128  ;;  %p522_p2 = scmp.lt.s32.totalorder %s434_s12, %s434_s12 }
  0x28   :  { %v112_v8 = vld [vmem:[#allocation5 + $0x1a8] sm:$0xff]  ;;  %222 = vmatprep.subr.mxu0 %v116_v4  ;;  %293 = vmatprep.subr.mxu1 %v118_v5  ;;  %v114_v9 = vld [vmem:[#allocation5 + $0x1b8] sm:$0xff]  ;;  %v111_v10 = vld [vmem:[#allocation5 + $0x1a0] sm:$0xff]  ;;  %p518_p1 = scmp.ne.s32.totalorder %s434_s12, %s517_s13  ;;  %p523_p3 = scmp.lt.s32.totalorder %s517_s13, %s517_s13 }
  0x29   :  { %v113_v11 = vld [vmem:[#allocation5 + $0x1b0] sm:$0xff]  ;;  %223 = vmatpush1.msra.mxu0 %v115_v6  ;;  %294 = vmatpush1.msra.mxu1 %v117_v7  ;;  %v108_v12 = vld [vmem:[#allocation5 + $0x188] sm:$0xff]  ;;  %v110_v13 = vld [vmem:[#allocation5 + $0x198] sm:$0xff] }
  0x2a   :  { %224 = vmatprep.subr.mxu0 %v112_v8  ;;  %295 = vmatprep.subr.mxu1 %v114_v9  ;;  %v107_v14 = vld [vmem:[#allocation5 + $0x180] sm:$0xff]  ;;  %v109_v15 = vld [vmem:[#allocation5 + $0x190] sm:$0xff]  ;;  %v104_v16 = vld [vmem:[#allocation5 + $0x168] sm:$0xff]  ;;  %p524_p4 = por %p523_p3, %p522_p2 }
  0x2b   :  { %225 = vmatpush1.msra.mxu0 %v111_v10  ;;  %296 = vmatpush1.msra.mxu1 %v113_v11  ;;  %v106_v17 = vld [vmem:[#allocation5 + $0x178] sm:$0xff]  ;;  %v103_v18 = vld [vmem:[#allocation5 + $0x160] sm:$0xff]  ;;  %v105_v19 = vld [vmem:[#allocation5 + $0x170] sm:$0xff] }
  0x2c   :  { %226 = vmatprep.subr.mxu0 %v108_v12  ;;  %297 = vmatprep.subr.mxu1 %v110_v13  ;;  %v100_v20 = vld [vmem:[#allocation5 + $0x148] sm:$0xff]  ;;  %v102_v21 = vld [vmem:[#allocation5 + $0x158] sm:$0xff]  ;;  %v99_v22 = vld [vmem:[#allocation5 + $0x140] sm:$0xff]  ;;  %p525_p5 = pnand %p524_p4, %p518_p1 }
  0x2d   :  { %227 = vmatpush1.msra.mxu0 %v107_v14  ;;  %298 = vmatpush1.msra.mxu1 %v109_v15  ;;  %v101_v23 = vld [vmem:[#allocation5 + $0x150] sm:$0xff]  ;;  %v96_v24 = vld [vmem:[#allocation5 + $0x128] sm:$0xff]  ;;  %v98_v25 = vld [vmem:[#allocation5 + $0x138] sm:$0xff] }
  0x2e   :  { %228 = vmatprep.subr.mxu0 %v104_v16  ;;  %299 = vmatprep.subr.mxu1 %v106_v17  ;;  %v95_v26 = vld [vmem:[#allocation5 + $0x120] sm:$0xff]  ;;  %v97_v27 = vld [vmem:[#allocation5 + $0x130] sm:$0xff]  ;;  %v92_v28 = vld [vmem:[#allocation5 + $0x108] sm:$0xff] }
  0x2f   :  { %229 = vmatpush1.msra.mxu0 %v103_v18  ;;  %300 = vmatpush1.msra.mxu1 %v105_v19  ;;  %v94_v29 = vld [vmem:[#allocation5 + $0x118] sm:$0xff]  ;;  %v91_v30 = vld [vmem:[#allocation5 + $0x100] sm:$0xff]  ;;  %v93_v31 = vld [vmem:[#allocation5 + $0x110] sm:$0xff] }
  0x30   :  { %230 = vmatprep.subr.mxu0 %v100_v20  ;;  %301 = vmatprep.subr.mxu1 %v102_v21  ;;  %v88_v32 = vld [vmem:[#allocation5 + $0xe8] sm:$0xff]  ;;  %v90_v33 = vld [vmem:[#allocation5 + $0xf8] sm:$0xff]  ;;  %v87_v34 = vld [vmem:[#allocation5 + $0xe0] sm:$0xff] }
  0x31   :  { %231 = vmatpush1.msra.mxu0 %v99_v22  ;;  %302 = vmatpush1.msra.mxu1 %v101_v23  ;;  %v89_v35 = vld [vmem:[#allocation5 + $0xf0] sm:$0xff]  ;;  %v84_v36 = vld [vmem:[#allocation5 + $0xc8] sm:$0xff]  ;;  %v86_v37 = vld [vmem:[#allocation5 + $0xd8] sm:$0xff] }
  0x32   :  { %232 = vmatprep.subr.mxu0 %v96_v24  ;;  %303 = vmatprep.subr.mxu1 %v98_v25  ;;  %v83_v38 = vld [vmem:[#allocation5 + $0xc0] sm:$0xff]  ;;  %v85_v39 = vld [vmem:[#allocation5 + $0xd0] sm:$0xff]  ;;  %v80_v40 = vld [vmem:[#allocation5 + $0xa8] sm:$0xff] }
  0x33   :  { %233 = vmatpush1.msra.mxu0 %v95_v26  ;;  %304 = vmatpush1.msra.mxu1 %v97_v27  ;;  %v82_v41 = vld [vmem:[#allocation5 + $0xb8] sm:$0xff]  ;;  %v79_v42 = vld [vmem:[#allocation5 + $0xa0] sm:$0xff]  ;;  %v81_v43 = vld [vmem:[#allocation5 + $0xb0] sm:$0xff] }
  0x34   :  { %234 = vmatprep.subr.mxu0 %v92_v28  ;;  %305 = vmatprep.subr.mxu1 %v94_v29  ;;  %v76_v44 = vld [vmem:[#allocation5 + $0x88] sm:$0xff]  ;;  %v78_v45 = vld [vmem:[#allocation5 + $0x98] sm:$0xff]  ;;  %v75_v46 = vld [vmem:[#allocation5 + $0x80] sm:$0xff] }
  0x35   :  { %235 = vmatpush1.msra.mxu0 %v91_v30  ;;  %306 = vmatpush1.msra.mxu1 %v93_v31  ;;  %v77_v47 = vld [vmem:[#allocation5 + $0x90] sm:$0xff]  ;;  %v72_v48 = vld [vmem:[#allocation5 + $0x68] sm:$0xff]  ;;  %v74_v49 = vld [vmem:[#allocation5 + $0x78] sm:$0xff] }
  0x36   :  { %236 = vmatprep.subr.mxu0 %v88_v32  ;;  %307 = vmatprep.subr.mxu1 %v90_v33  ;;  %v71_v50 = vld [vmem:[#allocation5 + $0x60] sm:$0xff]  ;;  %v73_v51 = vld [vmem:[#allocation5 + $0x70] sm:$0xff]  ;;  %v68_v52 = vld [vmem:[#allocation5 + $0x48] sm:$0xff] }
  0x37   :  { %237 = vmatpush1.msra.mxu0 %v87_v34  ;;  %308 = vmatpush1.msra.mxu1 %v89_v35  ;;  %v70_v53 = vld [vmem:[#allocation5 + $0x58] sm:$0xff]  ;;  %v67_v54 = vld [vmem:[#allocation5 + $0x40] sm:$0xff]  ;;  %v69_v55 = vld [vmem:[#allocation5 + $0x50] sm:$0xff] }
  0x38   :  { %238 = vmatprep.subr.mxu0 %v84_v36  ;;  %309 = vmatprep.subr.mxu1 %v86_v37  ;;  %v64_v56 = vld [vmem:[#allocation5 + $0x28] sm:$0xff]  ;;  %v66_v57 = vld [vmem:[#allocation5 + $0x38] sm:$0xff]  ;;  %v63_v58 = vld [vmem:[#allocation5 + $0x20] sm:$0xff] }
  0x39   :  { %239 = vmatpush1.msra.mxu0 %v83_v38  ;;  %310 = vmatpush1.msra.mxu1 %v85_v39  ;;  %v65_v59 = vld [vmem:[#allocation5 + $0x30] sm:$0xff]  ;;  %v60_v60 = vld [vmem:[#allocation5 + $0x8] sm:$0xff]  ;;  %v62_v61 = vld [vmem:[#allocation5 + $0x18] sm:$0xff] }
  0x3a   :  { %240 = vmatprep.subr.mxu0 %v80_v40  ;;  %311 = vmatprep.subr.mxu1 %v82_v41  ;;  %v59_v62 = vld [vmem:[#allocation5] sm:$0xff]  ;;  %v61_v63 = vld [vmem:[#allocation5 + $0x10] sm:$0xff]  ;;  %v184_v0 = vld [vmem:[#allocation5 + $0x3e8] sm:$0xff] }
  0x3b   :  { %241 = vmatpush1.msra.mxu0 %v79_v42  ;;  %312 = vmatpush1.msra.mxu1 %v81_v43  ;;  %v186_v1 = vld [vmem:[#allocation5 + $0x3f8] sm:$0xff]  ;;  %v183_v2 = vld [vmem:[#allocation5 + $0x3e0] sm:$0xff]  ;;  %v185_v3 = vld [vmem:[#allocation5 + $0x3f0] sm:$0xff] }
  0x3c   :  { %242 = vmatprep.subr.mxu0 %v76_v44  ;;  %313 = vmatprep.subr.mxu1 %v78_v45  ;;  %v180_v4 = vld [vmem:[#allocation5 + $0x3c8] sm:$0xff]  ;;  %v182_v5 = vld [vmem:[#allocation5 + $0x3d8] sm:$0xff]  ;;  %v179_v6 = vld [vmem:[#allocation5 + $0x3c0] sm:$0xff] }
  0x3d   :  { %243 = vmatpush1.msra.mxu0 %v75_v46  ;;  %314 = vmatpush1.msra.mxu1 %v77_v47  ;;  %v181_v7 = vld [vmem:[#allocation5 + $0x3d0] sm:$0xff]  ;;  %v176_v8 = vld [vmem:[#allocation5 + $0x3a8] sm:$0xff]  ;;  %v178_v9 = vld [vmem:[#allocation5 + $0x3b8] sm:$0xff] }
  0x3e   :  { %244 = vmatprep.subr.mxu0 %v72_v48  ;;  %315 = vmatprep.subr.mxu1 %v74_v49  ;;  %v175_v10 = vld [vmem:[#allocation5 + $0x3a0] sm:$0xff]  ;;  %v177_v11 = vld [vmem:[#allocation5 + $0x3b0] sm:$0xff]  ;;  %v172_v12 = vld [vmem:[#allocation5 + $0x388] sm:$0xff] }
  0x3f   :  { %245 = vmatpush1.msra.mxu0 %v71_v50  ;;  %316 = vmatpush1.msra.mxu1 %v73_v51  ;;  %v174_v13 = vld [vmem:[#allocation5 + $0x398] sm:$0xff]  ;;  %v171_v14 = vld [vmem:[#allocation5 + $0x380] sm:$0xff]  ;;  %v173_v15 = vld [vmem:[#allocation5 + $0x390] sm:$0xff] }
  0x40   :  { %246 = vmatprep.subr.mxu0 %v68_v52  ;;  %317 = vmatprep.subr.mxu1 %v70_v53  ;;  %v168_v16 = vld [vmem:[#allocation5 + $0x368] sm:$0xff]  ;;  %v170_v17 = vld [vmem:[#allocation5 + $0x378] sm:$0xff]  ;;  %v167_v18 = vld [vmem:[#allocation5 + $0x360] sm:$0xff] }
  0x41   :  { %247 = vmatpush1.msra.mxu0 %v67_v54  ;;  %318 = vmatpush1.msra.mxu1 %v69_v55  ;;  %v169_v19 = vld [vmem:[#allocation5 + $0x370] sm:$0xff]  ;;  %v164_v20 = vld [vmem:[#allocation5 + $0x348] sm:$0xff]  ;;  %v166_v21 = vld [vmem:[#allocation5 + $0x358] sm:$0xff] }
  0x42   :  { %248 = vmatprep.subr.mxu0 %v64_v56  ;;  %319 = vmatprep.subr.mxu1 %v66_v57  ;;  %v163_v22 = vld [vmem:[#allocation5 + $0x340] sm:$0xff]  ;;  %v165_v23 = vld [vmem:[#allocation5 + $0x350] sm:$0xff]  ;;  %v160_v24 = vld [vmem:[#allocation5 + $0x328] sm:$0xff] }
  0x43   :  { %249 = vmatpush1.msra.mxu0 %v63_v58  ;;  %320 = vmatpush1.msra.mxu1 %v65_v59  ;;  %v162_v25 = vld [vmem:[#allocation5 + $0x338] sm:$0xff]  ;;  %v159_v26 = vld [vmem:[#allocation5 + $0x320] sm:$0xff]  ;;  %v161_v27 = vld [vmem:[#allocation5 + $0x330] sm:$0xff] }
  0x44   :  { %250 = vmatprep.subr.mxu0 %v60_v60  ;;  %321 = vmatprep.subr.mxu1 %v62_v61  ;;  %v156_v28 = vld [vmem:[#allocation5 + $0x308] sm:$0xff]  ;;  %v158_v29 = vld [vmem:[#allocation5 + $0x318] sm:$0xff]  ;;  %v155_v30 = vld [vmem:[#allocation5 + $0x300] sm:$0xff] }
  0x45   :  { %251 = vmatpush1.msra.mxu0 %v59_v62  ;;  %322 = vmatpush1.msra.mxu1 %v61_v63  ;;  %v157_v31 = vld [vmem:[#allocation5 + $0x310] sm:$0xff]  ;;  %v152_v32 = vld [vmem:[#allocation5 + $0x2e8] sm:$0xff]  ;;  %v154_v33 = vld [vmem:[#allocation5 + $0x2f8] sm:$0xff] }
  0x46   :  { %252 = vmatprep.subr.mxu0 %v184_v0  ;;  %323 = vmatprep.subr.mxu1 %v186_v1  ;;  %v151_v34 = vld [vmem:[#allocation5 + $0x2e0] sm:$0xff]  ;;  %v153_v35 = vld [vmem:[#allocation5 + $0x2f0] sm:$0xff]  ;;  %v148_v36 = vld [vmem:[#allocation5 + $0x2c8] sm:$0xff] }
  0x47   :  { %253 = vmatpush2.msra.mxu0 %v183_v2  ;;  %324 = vmatpush2.msra.mxu1 %v185_v3  ;;  %v150_v37 = vld [vmem:[#allocation5 + $0x2d8] sm:$0xff]  ;;  %v147_v38 = vld [vmem:[#allocation5 + $0x2c0] sm:$0xff]  ;;  %v149_v39 = vld [vmem:[#allocation5 + $0x2d0] sm:$0xff]  ;;  %v189_v2 = vlaneseq }
  0x48   :  { %254 = vmatprep.subr.mxu0 %v180_v4  ;;  %325 = vmatprep.subr.mxu1 %v182_v5  ;;  %v144_v40 = vld [vmem:[#allocation5 + $0x2a8] sm:$0xff]  ;;  %v146_v41 = vld [vmem:[#allocation5 + $0x2b8] sm:$0xff]  ;;  %v143_v42 = vld [vmem:[#allocation5 + $0x2a0] sm:$0xff]  ;;  %v548_v5 = vmov 1983009808  }
  0x49   :  { %255 = vmatpush2.msra.mxu0 %v179_v6  ;;  %326 = vmatpush2.msra.mxu1 %v181_v7  ;;  %v145_v43 = vld [vmem:[#allocation5 + $0x2b0] sm:$0xff]  ;;  %v140_v44 = vld [vmem:[#allocation5 + $0x288] sm:$0xff]  ;;  %v142_v45 = vld [vmem:[#allocation5 + $0x298] sm:$0xff]  ;;  %v190_v3 = vshrl.u32 %v189_v2, 7  ;;  %v369_v6 = vunpack.c.l.s4 %v548_v5 }
  0x4a   :  { %256 = vmatprep.subr.mxu0 %v176_v8  ;;  %327 = vmatprep.subr.mxu1 %v178_v9  ;;  %v139_v46 = vld [vmem:[#allocation5 + $0x280] sm:$0xff]  ;;  %v141_v47 = vld [vmem:[#allocation5 + $0x290] sm:$0xff]  ;;  %v136_v48 = vld [vmem:[#allocation5 + $0x268] sm:$0xff] }
  0x4b   :  { %257 = vmatpush2.msra.mxu0 %v175_v10  ;;  %328 = vmatpush2.msra.mxu1 %v177_v11  ;;  %v138_v49 = vld [vmem:[#allocation5 + $0x278] sm:$0xff]  ;;  %v135_v50 = vld [vmem:[#allocation5 + $0x260] sm:$0xff]  ;;  %v137_v51 = vld [vmem:[#allocation5 + $0x270] sm:$0xff]  ;;  %v191_v4 = vsub.s32 0, %v190_v3  ;;  %v199_v7 = vsub.s32 2, %v190_v3  ;;  %v195_v8 = vsub.s32 1, %v190_v3  ;;  %v370_v11 = vunpack.c.0.s8 %v369_v6 }
  0x4c   :  { %258 = vmatprep.subr.mxu0 %v172_v12  ;;  %329 = vmatprep.subr.mxu1 %v174_v13  ;;  %v132_v52 = vld [vmem:[#allocation5 + $0x248] sm:$0xff]  ;;  %v134_v53 = vld [vmem:[#allocation5 + $0x258] sm:$0xff]  ;;  %v131_v54 = vld [vmem:[#allocation5 + $0x240] sm:$0xff]  ;;  %v203_v9 = vsub.s32 3, %v190_v3  ;;  %v549_v12 = vmov 1966171168  }
  0x4d   :  { %259 = vmatpush2.msra.mxu0 %v171_v14  ;;  %330 = vmatpush2.msra.mxu1 %v173_v15  ;;  %v133_v55 = vld [vmem:[#allocation5 + $0x250] sm:$0xff]  ;;  %v443_v56 = vld.sshfl [vmem:[#allocation2] sm:$0x33 pattern:$0x76325410]  ;;  %v128_v57 = vld [vmem:[#allocation5 + $0x228] sm:$0xff]  ;;  %v385_v13 = vunpack.c.l.s4 %v549_v12 }
  0x4e   :  { %260 = vmatprep.subr.mxu0 %v168_v16  ;;  %331 = vmatprep.subr.mxu1 %v170_v17  ;;  %v130_v58 = vld [vmem:[#allocation5 + $0x238] sm:$0xff]  ;;  %v127_v59 = vld [vmem:[#allocation5 + $0x220] sm:$0xff]  ;;  %v129_v60 = vld [vmem:[#allocation5 + $0x230] sm:$0xff]  ;;  %v217_v63 = vcombine.high %v443_v56, %v443_v56 }
  0x4f   :  { %261 = vmatpush2.msra.mxu0 %v167_v18  ;;  %332 = vmatpush2.msra.mxu1 %v169_v19  ;;  %v124_v61 = vld [vmem:[#allocation5 + $0x208] sm:$0xff]  ;;  %v126_v62 = vld [vmem:[#allocation5 + $0x218] sm:$0xff]  ;;  %v123_v0 = vld [vmem:[#allocation5 + $0x200] sm:$0xff] }
  0x50   :  { %262 = vmatprep.subr.mxu0 %v164_v20  ;;  %333 = vmatprep.subr.mxu1 %v166_v21  ;;  %v125_v1 = vld [vmem:[#allocation5 + $0x210] sm:$0xff]  ;;  %v187_v10 = vld [vmem:[#allocation7] sm:$0xf]  ;;  %v373_v21 = vsub.s32 %v370_v11, %v190_v3 }
  0x51   :  { %263 = vmatpush2.msra.mxu0 %v163_v22  ;;  %334 = vmatpush2.msra.mxu1 %v165_v23  ;;  %v192_v14 = vrot.slane %v187_v10, %v191_v4  ;;  %v200_v15 = vrot.slane %v187_v10, %v199_v7  ;;  %v196_v16 = vrot.slane %v187_v10, %v195_v8  ;;  %v386_v23 = vunpack.c.0.s8 %v385_v13 }
  0x52   :  { %264 = vmatprep.subr.mxu0 %v160_v24  ;;  %335 = vmatprep.subr.mxu1 %v162_v25  ;;  %v204_v17 = vrot.slane %v187_v10, %v203_v9 }
  0x53   :  { %265 = vmatpush2.msra.mxu0 %v159_v26  ;;  %336 = vmatpush2.msra.mxu1 %v161_v27 }
  0x54   :  { %266 = vmatprep.subr.mxu0 %v156_v28  ;;  %337 = vmatprep.subr.mxu1 %v158_v29 }
  0x55   :  { %267 = vmatpush2.msra.mxu0 %v155_v30  ;;  %338 = vmatpush2.msra.mxu1 %v157_v31 }
  0x56   :  { %268 = vmatprep.subr.mxu0 %v152_v32  ;;  %339 = vmatprep.subr.mxu1 %v154_v33  ;;  %v389_v32 = vsub.s32 %v386_v23, %v190_v3 }
  0x57   :  { %269 = vmatpush2.msra.mxu0 %v151_v34  ;;  %340 = vmatpush2.msra.mxu1 %v153_v35 }
  0x58   :  { %270 = vmatprep.subr.mxu0 %v148_v36  ;;  %341 = vmatprep.subr.mxu1 %v150_v37 }
  0x59   :  { %271 = vmatpush2.msra.mxu0 %v147_v38  ;;  %342 = vmatpush2.msra.mxu1 %v149_v39 }
  0x5a   :  { %272 = vmatprep.subr.mxu0 %v144_v40  ;;  %343 = vmatprep.subr.mxu1 %v146_v41 }
  0x5b   :  { %273 = vmatpush2.msra.mxu0 %v143_v42  ;;  %344 = vmatpush2.msra.mxu1 %v145_v43  ;;  %v444_v43 = vld [vmem:[%s602_s3] ss:$0 sm:$0xff] }
  0x5c   :  { %274 = vmatprep.subr.mxu0 %v140_v44  ;;  %345 = vmatprep.subr.mxu1 %v142_v45  ;;  %v445_v45 = vld [vmem:[%s603_s4] ss:$0 sm:$0xff] }
  0x5d   :  { %275 = vmatpush2.msra.mxu0 %v139_v46  ;;  %346 = vmatpush2.msra.mxu1 %v141_v47 }
  0x5e   :  { %276 = vmatprep.subr.mxu0 %v136_v48  ;;  %347 = vmatprep.subr.mxu1 %v138_v49 }
  0x5f   :  { %277 = vmatpush2.msra.mxu0 %v135_v50  ;;  %348 = vmatpush2.msra.mxu1 %v137_v51 }
  0x60   :  { %278 = vmatprep.subr.mxu0 %v132_v52  ;;  %349 = vmatprep.subr.mxu1 %v134_v53 }
  0x61   :  { %279 = vmatpush2.msra.mxu0 %v131_v54  ;;  %350 = vmatpush2.msra.mxu1 %v133_v55 }
  0x62   :  { %280 = vmatprep.subr.mxu0 %v128_v57  ;;  %351 = vmatprep.subr.mxu1 %v130_v58 }
  0x63   :  { %281 = vmatpush2.msra.mxu0 %v127_v59  ;;  %352 = vmatpush2.msra.mxu1 %v129_v60 }
  0x64   :  { %282 = vmatprep.subr.mxu0 %v124_v61  ;;  %353 = vmatprep.subr.mxu1 %v126_v62 }
  0x65   :  { %283 = vmatpush2.msra.mxu0 %v123_v0  ;;  %284 = vmatprep.mubr.f32.mxu0 %v217_v63 }
  0x66   :  { %354 = vmatpush2.msra.mxu1 %v125_v1  ;;  %355 = vmatprep.mubr.f32.mxu1 %v217_v63 }
  0x67   :  { %285 = vmatmul.mubr.f32.vlgmr.msra.gmra.mxu0 %v443_v56  ;;  %356 = vmatmul.mubr.f32.vlgmr.msra.gmra.mxu1 %v443_v56 }
 0x127   :  { %v286_v18 = vpop.f32.mrf.mxu0  ;;  %v357_v19 = vpop.f32.mrf.mxu1 }
 0x128   :  { %v287_v24 = vadd.f32 %v286_v18, %v192_v14  ;;  %v358_v25 = vadd.f32 %v357_v19, %v200_v15 }
 0x129   :  { %v288_v20 = vpop.f32.mrf.mxu0  ;;  %v359_v22 = vpop.f32.mrf.mxu1 }
 0x12a   :  { %v289_v26 = vadd.f32 %v288_v20, %v196_v16  ;;  %v360_v27 = vadd.f32 %v359_v22, %v204_v17 }
 0x12c   :  { %v366_v28 = vcombine.low %v287_v24, %v289_v26  ;;  %v367_v29 = vcombine.low %v358_v25, %v360_v27 }
 0x12e   :  { %v374_v30 = vrot.slane %v366_v28, %v373_v21  ;;  %v381_v31 = vrot.slane %v367_v29, %v373_v21 }
 0x130   :  { %v382_v33 = vcombine.low %v374_v30, %v381_v31 }
 0x132   :  { %v390_v34 = vrot.slane %v382_v33, %v389_v32 }
 0x134   :  { %391 = vadd.xlane.f32.xlu0 %v390_v34 }
 0x1bd   :  { %v392_v35 = vpop.xlane.xlu0 %391 }
 0x1be   :  { %v394_v36 = vmul.f32 0.0078125, %v392_v35 }
 0x1c0   :  { %v395_v37 = vsub.f32 %v390_v34, %v394_v36 }
 0x1c2   :  { %v396_v38 = vmul.f32 %v395_v37, %v395_v37 }
 0x1c4   :  { %397 = vadd.xlane.f32.xlu0 %v396_v38 }
 0x24d   :  { %v398_v39 = vpop.xlane.xlu0 %397 }
 0x24e   :  { %v399_v40 = vmul.f32 0.0078125, %v398_v39 }
 0x250   :  { %v400_v41 = vadd.f32 1e-05, %v399_v40 }
 0x252   :  { %455 = vrsqrt.f32 %v400_v41 }
 0x25f   :  { %v456_v42 = vpop.eup %455 }
 0x260   :  { %v402_v44 = vmul.f32 %v456_v42, %v395_v37 }
 0x262   :  { %v410_v46 = vmul.f32 %v444_v43, %v402_v44 }
 0x264   :  { %v418_v47 = vadd.f32 %v445_v45, %v410_v46 }
 0x266   :  { %446 = vst.sshfl [vmem:[#allocation8] sm:$0xff pattern:$0x75316420] %v418_v47 }
 0x267   :  { %528 = shalt.err (!%p525_p5)
}
 0x268   :  { %436 = dma.vmem_to_hbm [thread:$0]  %s434_s12, 128, %s604_s5, [#allocation4]  }
 0x269   :  { %541 = dma.done.wait [#allocation4], 128  }
 0x26a   :  { %542 = vsyncadd [#allocation4], 4294967168 }
 0x26b   :  { %440 = vsyncpa [#allocation3], 1 }
 0x26c   :  { %441 = vsyncpa [#allocation6], 1 }
 0x26d   :  { %442 = vsyncpa [#allocation4], 1 }

</bundles_post_ra>
